<compile_context>
chip_gen: v6e
topology: v6e:2x2x1
jax: 0.10.0
libtpu: 0.0.40
codegen_flags: <defaults>
</compile_context>

<pallas_src>
import jax
import jax.numpy as jnp
from jax.experimental import pallas as pl
from jax.experimental.pallas import tpu as pltpu

_LANE = 128
# Spatial f32-equivalent elems per block (tb * th * 128) for the 4D layout:
# per-buffer <= 3 MiB, double-buffered in + out <= 12 MiB.
_MAX_SPATIAL_4D = 256 * 1024
# Spatial elems per block (tb * tile) for the 3D fallback (C=3 sublane-pads to
# 8): per-buffer <= 4 MiB, double-buffered in + out <= 16 MiB.
_MAX_SPATIAL_3D = 128 * 1024
_VMEM_LIMIT = 32 * 1024 * 1024


def _cdiv(a: int, b: int) -> int:
    return -(-a // b)


def _round_up(n: int, m: int) -> int:
    return _cdiv(n, m) * m


def _largest_divisor_leq(n: int, cap: int) -> int:
    cap = max(1, min(n, cap))
    for cand in range(cap, 0, -1):
        if n % cand == 0:
            return cand
    return 1


def _saturation_kernel(factor_ref, x_ref, o_ref):
    # factor_ref: SMEM (1,) f32 holding the precomputed saturation factor.
    f = factor_ref[0]
    omf = 1.0 - f

    x = x_ref[...].astype(jnp.float32)          # (tb, 3, ...) block
    r = x[:, 0:1]
    g = x[:, 1:2]
    b = x[:, 2:3]
    gray = 0.299 * r + 0.587 * g + 0.114 * b    # broadcasts over the channel dim

    o_ref[...] = jnp.clip(x * f + gray * omf, 0.0, 1.0).astype(o_ref.dtype)


def _tile_4d(B: int, rows: int, row_align: int):
    """Pick (tb, th, n_tiles) for the (B, 3, rows, 128) layout."""
    max_rows = max(row_align, _MAX_SPATIAL_4D // _LANE)
    if rows <= max_rows:
        th, n_t = rows, 1                       # full spatial extent per block
        tb = _largest_divisor_leq(B, max(1, max_rows // rows))
    else:
        tb = 1
        th = (max_rows // row_align) * row_align
        n_t = _cdiv(rows, th)
    # Keep >= 2 grid steps so both v7x TensorCores get work.
    if (B // tb) * n_t == 1:
        if B >= 2:
            tb = _largest_divisor_leq(B, B // 2)
        elif rows >= 2 * row_align:
            th = _round_up(_cdiv(rows, 2), row_align)
            n_t = _cdiv(rows, th)
    return tb, th, n_t


def _tile_3d(B: int, P: int):
    """Pick (tb, tile, n_tiles) for the flat (B, 3, P) layout (ragged tail)."""
    if P <= _LANE:
        tile, n_t = P, 1
    else:
        max_tile = max(_LANE, (_MAX_SPATIAL_3D // _LANE) * _LANE)
        tile = min(max_tile, (P // _LANE) * _LANE)   # multiple of 128, <= P
        n_t = _cdiv(P, tile)                         # boundary block is clipped
    tb = _largest_divisor_leq(B, max(1, _MAX_SPATIAL_3D // tile))
    if (B // tb) * n_t == 1 and B >= 2:
        tb = _largest_divisor_leq(B, B // 2)
    return tb, tile, n_t


def saturation_layer(x: jax.Array, param: jax.Array) -> jax.Array:
    """Training-mode forward of SaturationLayer.

    x:     (B, 3, H, W) floating dtype, values expected in [0, 1]
    param: (1,) learnable parameter
    """
    if x.shape[0] == 0:
        return x
    B, C, H, W = x.shape
    assert C == 3, "SaturationLayer expects RGB (C=3) input"

    if not jnp.issubdtype(x.dtype, jnp.floating):
        x = x.astype(jnp.float32)
    out_dtype = x.dtype
    itemsize = jnp.dtype(out_dtype).itemsize
    row_align = max(8, 32 // itemsize)          # sublane multiple for this dtype

    # Hoisted scalar: activation(p) * 2 == ((tanh(p)+1)/2)*2 == tanh(p) + 1.
    factor = jnp.tanh(param.astype(jnp.float32)).reshape(-1)[:1] + 1.0   # (1,)

    P = H * W
    if P % _LANE == 0:
        # Lane-dense 4D layout: last two block dims are full (th, 128) tiles.
        rows = P // _LANE
        xf = x.reshape(B, C, rows, _LANE)       # free for contiguous NCHW
        tb, th, n_t = _tile_4d(B, rows, row_align)
        block = (tb, C, th, _LANE)
        index_map = lambda b, t: (b, 0, t, 0)
    else:
        # Ragged spatial tail: no host-side pad/slice. Pallas clips the
        # boundary block; OOB reads are garbage but their writes are dropped.
        xf = x.reshape(B, C, P)
        tb, tile, n_t = _tile_3d(B, P)
        block = (tb, C, tile)
        index_map = lambda b, t: (b, 0, t)

    grid = (B // tb, n_t)

    out = pl.pallas_call(
        _saturation_kernel,
        out_shape=jax.ShapeDtypeStruct(xf.shape, out_dtype),
        grid=grid,
        in_specs=[
            pl.BlockSpec(memory_space=pltpu.SMEM),      # factor (1,) scalar
            pl.BlockSpec(block, index_map),             # x tile (input dtype)
        ],
        out_specs=pl.BlockSpec(block, index_map),
        compiler_params=pltpu.CompilerParams(
            dimension_semantics=("parallel", "parallel"),
            vmem_limit_bytes=_VMEM_LIMIT,
        ),
    )(factor, xf)

    return out.reshape(B, C, H, W)


def _reference(x, param):
    factor = jnp.tanh(param.astype(jnp.float32))[0] + 1.0
    xf = x.astype(jnp.float32)
    r, g, b = xf[:, 0:1], xf[:, 1:2], xf[:, 2:3]
    gray = 0.299 * r + 0.587 * g + 0.114 * b
    return jnp.clip((xf - gray) * factor + gray, 0.0, 1.0)


if __name__ == "__main__":
    key = jax.random.PRNGKey(0)
    kp, kx1, kx2, kx3 = jax.random.split(key, 4)

    # Deterministic stand-in for nn.Parameter(torch.rand(1)).
    param = jax.random.uniform(kp, (1,), dtype=jnp.float32)

    # Case 1: H*W multiple of 128 -> lane-dense 4D path.
    x1 = jax.random.uniform(kx1, (2, 3, 16, 16), dtype=jnp.float32)
    out1 = jax.block_until_ready(saturation_layer(x1, param))
    ref1 = _reference(x1, param)
    assert out1.shape == x1.shape and out1.dtype == x1.dtype
    assert jnp.allclose(out1, ref1, atol=1e-5, rtol=1e-5)

    # Case 2: H*W not a multiple of 128 -> ragged 3D path (no pad/slice passes).
    x2 = jax.random.uniform(kx2, (4, 3, 20, 20), dtype=jnp.float32)
    out2 = jax.block_until_ready(saturation_layer(x2, param))
    ref2 = _reference(x2, param)
    assert out2.shape == x2.shape and out2.dtype == x2.dtype
    assert jnp.allclose(out2, ref2, atol=1e-5, rtol=1e-5)

    # Case 3: bf16 input is kept through the kernel (f32 math, bf16 I/O).
    x3 = jax.random.uniform(kx3, (2, 3, 64, 32), dtype=jnp.float32).astype(jnp.bfloat16)
    out3 = jax.block_until_ready(saturation_layer(x3, param))
    ref3 = _reference(x3.astype(jnp.float32), param)
    assert out3.shape == x3.shape and out3.dtype == jnp.bfloat16
    assert jnp.allclose(out3.astype(jnp.float32), ref3, atol=2e-2, rtol=2e-2)

    print("KERNEL_OK")
</pallas_src>

<mosaic_0001>
module attributes {stable_mosaic.version = 11 : i64} {
  func.func @_saturation_kernel(%arg0: i32, %arg1: i32, %arg2: memref<1xf32, #tpu.memory_space<smem>>, %arg3: memref<1x3x2x128xf32, #tpu.memory_space<vmem>>, %arg4: memref<1x3x2x128xf32, #tpu.memory_space<vmem>>) attributes {dimension_semantics = [#tpu.dimension_semantics<parallel>, #tpu.dimension_semantics<parallel>], iteration_bounds = array<i64: 2, 1>, scalar_prefetch = 0 : i64, scratch_operands = 0 : i64, tpu.core_type = #tpu.core_type<tc>, window_params = [{transform_indices = @transform_0, window_bounds = array<i64: 1>}, {transform_indices = @transform_1, window_bounds = array<i64: 1, 3, 2, 128>}, {transform_indices = @transform_2, window_bounds = array<i64: 1, 3, 2, 128>}]} {
    %c0 = arith.constant 0 : index
    %0 = memref.load %arg2[%c0] : memref<1xf32, #tpu.memory_space<smem>>
    %cst = arith.constant 1.000000e+00 : f32
    %1 = arith.subf %cst, %0 : f32
    %c0_0 = arith.constant 0 : index
    %c0_1 = arith.constant 0 : index
    %c0_2 = arith.constant 0 : index
    %c0_3 = arith.constant 0 : index
    %2 = vector.load %arg3[%c0_0, %c0_1, %c0_2, %c0_3] : memref<1x3x2x128xf32, #tpu.memory_space<vmem>>, vector<1x3x2x128xf32>
    %3 = vector.extract_strided_slice %2 {offsets = [0, 0, 0, 0], sizes = [1, 1, 2, 128], strides = [1, 1, 1, 1]} : vector<1x3x2x128xf32> to vector<1x1x2x128xf32>
    %4 = vector.extract_strided_slice %2 {offsets = [0, 1, 0, 0], sizes = [1, 1, 2, 128], strides = [1, 1, 1, 1]} : vector<1x3x2x128xf32> to vector<1x1x2x128xf32>
    %5 = vector.extract_strided_slice %2 {offsets = [0, 2, 0, 0], sizes = [1, 1, 2, 128], strides = [1, 1, 1, 1]} : vector<1x3x2x128xf32> to vector<1x1x2x128xf32>
    %cst_4 = arith.constant 2.990000e-01 : f32
    %6 = vector.broadcast %cst_4 : f32 to vector<1x1x2x128xf32>
    %7 = arith.mulf %6, %3 : vector<1x1x2x128xf32>
    %cst_5 = arith.constant 5.870000e-01 : f32
    %8 = vector.broadcast %cst_5 : f32 to vector<1x1x2x128xf32>
    %9 = arith.mulf %8, %4 : vector<1x1x2x128xf32>
    %10 = arith.addf %7, %9 : vector<1x1x2x128xf32>
    %cst_6 = arith.constant 1.140000e-01 : f32
    %11 = vector.broadcast %cst_6 : f32 to vector<1x1x2x128xf32>
    %12 = arith.mulf %11, %5 : vector<1x1x2x128xf32>
    %13 = arith.addf %10, %12 : vector<1x1x2x128xf32>
    %14 = vector.broadcast %0 : f32 to vector<1x3x2x128xf32>
    %15 = arith.mulf %2, %14 : vector<1x3x2x128xf32>
    %16 = vector.broadcast %1 : f32 to vector<1x1x2x128xf32>
    %17 = arith.mulf %13, %16 : vector<1x1x2x128xf32>
    %18 = vector.broadcast %17 : vector<1x1x2x128xf32> to vector<1x3x2x128xf32>
    %19 = arith.addf %15, %18 : vector<1x3x2x128xf32>
    %cst_7 = arith.constant 0.000000e+00 : f32
    %cst_8 = arith.constant 1.000000e+00 : f32
    %20 = vector.broadcast %cst_7 : f32 to vector<1x3x2x128xf32>
    %21 = arith.maximumf %20, %19 : vector<1x3x2x128xf32>
    %22 = vector.broadcast %cst_8 : f32 to vector<1x3x2x128xf32>
    %23 = arith.minimumf %22, %21 : vector<1x3x2x128xf32>
    %c0_9 = arith.constant 0 : index
    %c0_10 = arith.constant 0 : index
    %c0_11 = arith.constant 0 : index
    %c0_12 = arith.constant 0 : index
    %24 = vector.load %arg4[%c0_9, %c0_10, %c0_11, %c0_12] : memref<1x3x2x128xf32, #tpu.memory_space<vmem>>, vector<1x3x2x128xf32>
    tpu.vector_store %arg4[%c0_9, %c0_10, %c0_11, %c0_12], %23 {strides = array<i32>} : memref<1x3x2x128xf32, #tpu.memory_space<vmem>>, vector<1x3x2x128xf32>,
    return
  }
  func.func @transform_0(%arg0: i32, %arg1: i32) -> i32 {
    %c0_i32 = arith.constant 0 : i32
    %c0_i32_0 = arith.constant 0 : i32
    return %c0_i32 : i32
  }
  func.func @transform_1(%arg0: i32, %arg1: i32) -> (i32, i32, i32, i32) {
    %c0_i32 = arith.constant 0 : i32
    %c0_i32_0 = arith.constant 0 : i32
    %c0_i32_1 = arith.constant 0 : i32
    return %arg0, %c0_i32, %arg1, %c0_i32_0 : i32, i32, i32, i32
  }
  func.func @transform_2(%arg0: i32, %arg1: i32) -> (i32, i32, i32, i32) {
    %c0_i32 = arith.constant 0 : i32
    %c0_i32_0 = arith.constant 0 : i32
    %c0_i32_1 = arith.constant 0 : i32
    return %arg0, %c0_i32, %arg1, %c0_i32_0 : i32, i32, i32, i32
  }
}

</mosaic_0001>

<bundles_post_ra>
// kernel: tpu_custom_call.1
= control target key start
LH: loop header
LB: loop body
LE: loop exit
PB: predicated region body
PF: predicated region fallthrough
CT: control target
= control target key end

     0   :  { %s667_s0 = inlined_call_operand.<no memory space> [shape: f32[1], index: 0, kind: input, shape index: {}]   ;;  %s668_s1 = inlined_call_operand.hbm [shape: f32[2,3,2,128], index: 1, kind: input, shape index: {}]   ;;  %s669_s2 = inlined_call_operand.hbm [shape: f32[2,3,2,128], index: 2, kind: output, shape index: {}]  }
   0x1   :  { %7 = sst [smem:[#allocation2]] %s667_s0 }
   0x2   :  { %8 = vsyncpa [#allocation4], 0 }
   0x3   :  { %10 = vsyncpa [#allocation4 + $0x1], 0 }
   0x4   :  { %11 = vsyncpa [#allocation5], 0 }
   0x5   :  { %13 = vsyncpa [#allocation5 + $0x1], 0  ;;  %s521_s11 = smov 0   ;;  %s523_s12 = smov 0  }
   0x6   :  { %s525_s13 = smov 0   ;;  %s527_s14 = smov 0  }
   0x7   :  { %s529_s15 = smov 0   ;;  %s531_s16 = smov 0  }
   0x8 LB: > { %s308_s0 = sadd.s32 4294967295, %s495_s16   ;;  %s309_s17 = sadd.s32 4294967294, %s495_s16   ;;  %s495_s16 = sphi %s531_s16, %s19_s16   ;;  %s491_s15 = sphi %s529_s15, %s680_s15   ;;  %s487_s14 = sphi %s527_s14, %s679_s14   ;;  %s483_s13 = sphi %s525_s13, %s678_s13   ;;  %s479_s12 = sphi %s523_s12, %s677_s12   ;;  %s475_s11 = sphi %s521_s11, %s676_s11  }
   0x9   : > { %s31_s18 = sadd.s32 1, %s491_s15  ;;  %s61_s19 = sadd.s32 1, %s483_s13 }
   0xa   : > { %p33_p0 = scmp.ge.s32.totalorder %s31_s18, 2  ;;  %p68_p1 = scmp.ne.s32.totalorder %s483_s13, %s479_s12 }
   0xb   : > { %p69_p2 = scmp.eq.s32.totalorder %s495_s16, 0  ;;  %p74_p3 = scmp.ne.s32.totalorder %s479_s12, %s475_s11 }
   0xc   : > { %s682_s18 = smov (%p33_p0, %s31_s18), 0  ;;  %p75_p5 = scmp.eq.s32.totalorder %s308_s0, 0 }
   0xd   : > { %p562_p4 = por %p69_p2, %p68_p1  ;;  %s56_s21 = ssub.s32 %s491_s15, %s682_s18 }
   0xe   : > { %p100_p6 = scmp.eq.s32.totalorder %s308_s0, 1  ;;  %p59_p7 = scmp.eq.s32.totalorder %s56_s21, 0 }
   0xf   : > { %p568_p8 = por %p75_p5, %p74_p3  ;;  %p106_p10 = scmp.eq.s32.totalorder %s309_s17, 1 }
  0x10   : > { %p572_p9 = por %p100_p6, %p68_p1  ;;  %p333_p13 = scmp.lt.s32.totalorder %s495_s16, 2 }
  0x11   : > { %s577_s24 = scalar_select %p59_p7, %s483_s13, %s61_s19  }
  0x12   : > { %p579_p11 = por %p106_p10, %p74_p3  ;;  %s129_s26 = sand.u32 1, %s483_s13  }
  0x13   : > { %s317_s27 = smul.u32 6, %s129_s26  ;;  %p589_p0 = pnand %p333_p13, %p562_p4 }
  0x14   : > { %s318_s28 = smul.u32 96, %s491_s15  ;;  %p313_p1 = scmp.ge.s32.totalorder %s495_s16, 1 }
  0x15   : > { %s133_s5 = scalar_lea.vmem [#allocation3], %s317_s27  ;;  %s130_s7 = scalar_lea.sflag [#allocation4], %s129_s26 }
  0x16   : > { %s140_s4 = scalar_lea.hbm %s668_s1, %s318_s28  ;;  %s141_s6 = sshll.u32 %s133_s5, 4  ;;  %s142_s6 = int_to_ptr.vmem [resolvable:$true] %s141_s6 }
  0x17   : > { %p389_p2 = pneg %p589_p0  ;;  %s400_s8 = scalar_lea.vmem %s142_s6, 96 }
  0x18   : > { %p401_p3 = scmp.ne.s32.totalorder %s142_s6, %s400_s8  ;;  %s497_s9 = smov [#allocation3]  }
  0x19   : > { %s405_s10 = sshll.u32 %s497_s9, 4  ;;  %s406_s10 = int_to_ptr.vmem [resolvable:$false] %s405_s10 }
  0x1a   : > { %p403_p5 = pnand %p401_p3, %p389_p2  ;;  %s407_s0 = scalar_lea.vmem %s406_s10, 192 }
  0x1b   : > { %p408_p4 = scmp.lt.s32.totalorder %s142_s6, %s406_s10  ;;  %p409_p7 = scmp.lt.s32.totalorder %s407_s0, %s400_s8 }
  0x1c   : > { %p404_p6 = pneg %p403_p5 }
  0x1d   : > { %p410_p10 = por %p409_p7, %p408_p4 }
  0x1f   : > { %p411_p13 = pnand %p410_p10, %p404_p6 }
  0x21   : > { %414 = shalt.err (!%p411_p13)
}
  0x22   : > { %s498_s17 = smov 32   ;;  %s499_s19 = smov 2  }
  0x23   : > { %328 = dma.hbm_to_vmem [thread:$0]  (!%p589_p0), %s140_s4, 96, %s142_s6, %s130_s7, %s498_s17, %s498_s17, %s499_s19  }
  0x24   : > { %p149_p12 = scmp.lt.s32.totalorder %s495_s16, 3 }
  0x26   : > { %p150_p2 = pnand %p313_p1, %p149_p12 }
  0x27   : > { %s605_s20 = sand.u32 (!%p150_p2), 1, %s479_s12  }
  0x28   : > { %153 = sbr.rel (%p150_p2) target bundleno = 78 (0x4e), region = 28  ;;  %s156_s26 = scalar_lea.sflag (!%p150_p2), [#allocation4], %s605_s20 }
  0x29   : > { %s319_s21 = smul.u32 (!%p150_p2), 6, %s605_s20 }
  0x2b   : > { %s159_s27 = scalar_lea.vmem (!%p150_p2), [#allocation3], %s319_s21 }
  0x2d   : > { %466 = dma.done.wait (%p568_p8), %s156_s26, 96  }
  0x2e   : > { %468 = vsyncadd (%p568_p8), %s156_s26, 4294967200  ;;  %s180_s28 = sld [smem:[#allocation2]]  ;;  %v182_v0 = vld [vmem:[%s159_s27] sm:$0x3]  ;;  %v183_v1 = vld [vmem:[%s159_s27 + $0x2] sm:$0x3] }
  0x2f   : > { %v184_v2 = vld [vmem:[%s159_s27 + $0x4] sm:$0x3]  ;;  %v185_v3 = vmul.f32 0.299, %v182_v0  ;;  %v186_v4 = vmul.f32 0.587, %v183_v1 }
  0x30   : > { %v188_v5 = vmul.f32 0.114, %v184_v2  ;;  %s179_s22 = scalar_lea.vmem [#allocation6], %s319_s21  ;;  %s320_s3 = smul.u32 96, %s487_s14 }
  0x31   : > { %v187_v7 = vadd.f32 %v186_v4, %v185_v3  ;;  %s223_s30 = sshll.u32 %s179_s22, 4  ;;  %s209_s14 = scalar_lea.sflag [#allocation5], %s605_s20  ;;  %s614_s30 = int_to_ptr.vmem [resolvable:$true] %s223_s30 }
  0x32   : > { %s619_s6 = scalar_lea.hbm %s669_s2, %s320_s3  ;;  %s415_s7 = scalar_lea.vmem %s614_s30, 96 }
  0x33   : > { %v189_v9 = vadd.f32 %v188_v5, %v187_v7  ;;  %p416_p8 = scmp.ne.s32.totalorder %s614_s30, %s415_s7  ;;  %s500_s8 = smov [#allocation6]  }
  0x34   : > { %s181_s29 = ssub.f32 1.0, %s180_s28  ;;  %v190_v6 = vstv %s180_s28  ;;  %s419_s9 = sshll.u32 %s500_s8, 4  ;;  %s420_s9 = int_to_ptr.vmem [resolvable:$false] %s419_s9 }
  0x35   : > { %v191_v10 = vmul.f32 %v190_v6, %v182_v0  ;;  %v192_v11 = vmul.f32 %v190_v6, %v183_v1  ;;  %v193_v12 = vmul.f32 %v190_v6, %v184_v2  ;;  %p417_p12 = pnand %p416_p8, %p572_p9  ;;  %s421_s10 = scalar_lea.vmem %s420_s9, 192 }
  0x36   : > { %v194_v8 = vstv %s181_s29  ;;  %p422_p1 = scmp.lt.s32.totalorder %s614_s30, %s420_s9  ;;  %p423_p3 = scmp.lt.s32.totalorder %s421_s10, %s415_s7 }
  0x37   : > { %v195_v13 = vmul.f32 %v194_v8, %v189_v9  ;;  %p418_p0 = pneg %p417_p12 }
  0x38   : > { %p424_p5 = por %p423_p3, %p422_p1 }
  0x39   : > { %v196_v14 = vadd.f32 %v195_v13, %v191_v10  ;;  %v197_v15 = vadd.f32 %v195_v13, %v192_v11  ;;  %v198_v16 = vadd.f32 %v195_v13, %v193_v12 }
  0x3a   : > { %p425_p6 = pnand %p424_p5, %p418_p0 }
  0x3b   : > { %v199_v17 = vmax.f32 %v196_v14, 0.0  ;;  %v200_v18 = vmax.f32 %v197_v15, 0.0  ;;  %v201_v19 = vmax.f32 %v198_v16, 0.0 }
  0x3d   : > { %v202_v20 = vmin.f32 %v199_v17, 1.0  ;;  %v203_v21 = vmin.f32 %v200_v18, 1.0  ;;  %v204_v22 = vmin.f32 %v201_v19, 1.0 }
  0x3f   : > { %205 = vst [vmem:[%s179_s22] sm:$0x3] %v202_v20  ;;  %206 = vst [vmem:[%s179_s22 + $0x2] sm:$0x3] %v203_v21 }
  0x40   : > { %207 = vst [vmem:[%s179_s22 + $0x4] sm:$0x3] %v204_v22 }
  0x41   : > { %428 = shalt.err (!%p425_p6)
}
  0x42   : > { %s429_s0 = scalar_lea.hbm %s619_s6, 96  ;;  %s433_s21 = scalar_lea.hbm %s669_s2, 192 }
  0x43   : > { %p430_p4 = scmp.ne.s32.totalorder %s619_s6, %s429_s0  ;;  %p434_p13 = scmp.lt.s32.totalorder %s619_s6, %s669_s2 }
  0x44   : > { %p435_p2 = scmp.lt.s32.totalorder %s433_s21, %s429_s0 }
  0x45   : > { %p431_p7 = pnand %p430_p4, %p572_p9 }
  0x46   : > { %p436_p8 = por %p435_p2, %p434_p13 }
  0x47   : > { %p432_p10 = pneg %p431_p7 }
  0x49   : > { %p437_p12 = pnand %p436_p8, %p432_p10 }
  0x4b   : > { %440 = shalt.err (!%p437_p12)
}
  0x4c   : > { %s501_s28 = smov 32   ;;  %s502_s29 = smov 2  }
  0x4d   : > { %323 = dma.vmem_to_hbm [thread:$0]  (%p572_p9), %s614_s30, 96, %s619_s6, %s209_s14, %s501_s28, %s501_s28, %s502_s29  }
  0x4e PF: > { %s238_s22 = sand.u32 1, %s475_s11   ;;  %p675_p0 = scmp.ge.s32.totalorder %s495_s16, 2 }
  0x4f   : > { %s239_s3 = scalar_lea.sflag [#allocation5], %s238_s22 }
  0x50   : > { %p330_p1 = pnand %p675_p0, %p579_p11 }
  0x52   : > { %p331_p3 = pneg %p330_p1 }
  0x54   : > { %470 = dma.done.wait (%p331_p3), %s239_s3, 96  }
  0x55   : > { %472 = vsyncadd (%p331_p3), %s239_s3, 4294967200  ;;  %s19_s16 = sadd.s32 1, %s495_s16   ;;  %s676_s11 = smov %s479_s12 }
  0x56   : > { %p16_p5 = scmp.ge.s32.totalorder %s19_s16, 4   ;;  %s677_s12 = smov %s483_s13 }
  0x57   : > { %s678_s13 = smov %s577_s24  ;;  %s679_s14 = smov %s491_s15 }
  0x58   : > { %s680_s15 = smov %s682_s18  ;;  %18 = sbr.rel (!%p16_p5) target bundleno = 8 (0x8), region = 73 }
  0x5d   :  { %244 = vsyncpa [#allocation4], 1 }
  0x5e   :  { %246 = vsyncpa [#allocation4 + $0x1], 1 }
  0x5f   :  { %247 = vsyncpa [#allocation5], 1 }
  0x60   :  { %249 = vsyncpa [#allocation5 + $0x1], 1 }

</bundles_post_ra>
